<compile_context>
chip_gen: v6e
topology: v6e:2x2x1
jax: 0.10.0
libtpu: 0.0.40
codegen_flags: <defaults>
</compile_context>

<pallas_src>
import functools

import jax
import jax.numpy as jnp
from jax.experimental import pallas as pl
from jax.experimental.pallas import tpu as pltpu


def _round_up(x, m):
    return ((x + m - 1) // m) * m


def _lane_tile_divisor(total, cap):
    """Largest multiple of 128 that divides `total` (a multiple of 128) and is <= cap."""
    q = total // 128
    cap_q = max(1, cap // 128)
    best = 1
    for d in range(1, min(q, cap_q) + 1):
        if q % d == 0:
            best = d
    return best * 128


def _sublane_multiple(dtype):
    # Packed sublane granularity: f32 -> 8 rows/vreg, bf16 -> 16, int8/fp8 -> 32.
    return {4: 8, 2: 16, 1: 32}.get(jnp.dtype(dtype).itemsize, 8)


def _vmem_capacity_bytes():
    # Generation-aware (v5e/v6e: 128 MiB, v7x: 64 MiB per TensorCore).
    try:
        info = pltpu.get_tpu_info()
        cap = getattr(info, "vmem_capacity_bytes", None)
        if cap:
            return int(cap)
    except Exception:
        pass
    return 128 * 1024 * 1024


# ---------------------------------------------------------------------------
# Kernels
# ---------------------------------------------------------------------------

def _kernel_accum_into_out(x_ref, w_ref, b_ref, o_ref):
    """out dtype == f32: the output block doubles as the accumulator (resident over K)."""
    j = pl.program_id(1)
    k = pl.program_id(2)
    tn = o_ref.shape[1]

    @pl.when(k == 0)
    def _init():
        # Fold bias straight into the accumulator; bias block is resident for the
        # whole grid, slice the current N tile (128-aligned start).
        col = pl.multiple_of(j * tn, 128)
        o_ref[...] = jnp.broadcast_to(b_ref[:, pl.ds(col, tn)], o_ref.shape)

    o_ref[...] += jnp.dot(x_ref[...], w_ref[...],
                          preferred_element_type=jnp.float32)


def _kernel_scratch_acc(x_ref, w_ref, b_ref, o_ref, acc_ref):
    """Non-f32 output dtype: accumulate in an f32 VMEM scratch, cast on the last K step."""
    j = pl.program_id(1)
    k = pl.program_id(2)
    tn = acc_ref.shape[1]

    @pl.when(k == 0)
    def _init():
        col = pl.multiple_of(j * tn, 128)
        acc_ref[...] = jnp.broadcast_to(b_ref[:, pl.ds(col, tn)], acc_ref.shape)

    acc_ref[...] += jnp.dot(x_ref[...], w_ref[...],
                            preferred_element_type=jnp.float32)

    @pl.when(k == pl.num_programs(2) - 1)
    def _fin():
        o_ref[...] = acc_ref[...].astype(o_ref.dtype)


# ---------------------------------------------------------------------------
# Wrapper
# ---------------------------------------------------------------------------

def prepare_sparse_linear(weight, mask, bias, *, compute_dtype=jnp.bfloat16):
    """One-time weight preparation (do this once per parameter update, not per forward).

    weight : (out_features, in_features)
    mask   : (out_features, in_features) 0/1
    bias   : (out_features,) or None
    """
    out_f, in_f = weight.shape
    in_pad = _round_up(in_f, 128)
    out_pad = _round_up(out_f, 128)

    # y = x @ (weight*mask).T + bias  ==  x @ wm_t + bias  with wm_t = (weight*mask).T
    wm_t = (weight * mask).T.astype(compute_dtype)                    # (in_f, out_f)
    wm_t = jnp.pad(wm_t, ((0, in_pad - in_f), (0, out_pad - out_f)))  # (in_pad, out_pad)

    if bias is None:
        bias = jnp.zeros((out_f,), jnp.float32)
    bias2d = jnp.pad(bias.astype(jnp.float32),
                     (0, out_pad - out_f)).reshape(1, out_pad)

    return {
        "wm_t": wm_t,                 # (in_pad, out_pad) in compute_dtype
        "bias2d": bias2d,             # (1, out_pad) f32
        "in_features": in_f,
        "out_features": out_f,
        "compute_dtype": jnp.dtype(compute_dtype),
    }


def sparse_linear_apply(params, x, *, tm_max=512, tn_max=512, tk_max=2048):
    """Per-forward path: y = x @ (weight*mask).T + bias using prepared params."""
    wm_t = params["wm_t"]
    bias2d = params["bias2d"]
    in_f = params["in_features"]
    out_f = params["out_features"]
    compute_dtype = params["compute_dtype"]

    B = x.shape[0]
    out_dtype = x.dtype
    in_pad, out_pad = wm_t.shape

    itemsize = jnp.dtype(compute_dtype).itemsize
    out_itemsize = jnp.dtype(out_dtype).itemsize
    sub_m = _sublane_multiple(compute_dtype)
    out_is_f32 = jnp.dtype(out_dtype) == jnp.dtype(jnp.float32)

    # Padding-aware lane tiles: exact divisors of the 128-rounded dims.
    tn = _lane_tile_divisor(out_pad, tn_max)
    tk = _lane_tile_divisor(in_pad, tk_max)
    tm = min(tm_max, _round_up(B, sub_m))

    vmem_budget = int(_vmem_capacity_bytes() * 0.6)

    def footprint(tm_, tn_, tk_):
        f = (2 * (tm_ * tk_ + tk_ * tn_) * itemsize   # double-buffered x / w tiles
             + 2 * out_pad * 4                        # resident bias block
             + 2 * tm_ * tn_ * out_itemsize)          # double-buffered output tile
        if not out_is_f32:
            f += tm_ * tn_ * 4                        # f32 scratch accumulator
        return f

    # Shrink K, then N, then M until the working set fits the per-generation budget.
    while footprint(tm, tn, tk) > vmem_budget and tk > 128:
        tk = _lane_tile_divisor(in_pad, tk // 2)
    while footprint(tm, tn, tk) > vmem_budget and tn > 128:
        tn = _lane_tile_divisor(out_pad, tn // 2)
    while footprint(tm, tn, tk) > vmem_budget and tm > sub_m:
        tm = max(sub_m, _round_up(tm // 2, sub_m))

    b_pad = _round_up(B, tm)

    # Make sure at least one parallel axis has >= 2 tiles when possible so v7x's two
    # TensorCores both get work (splitting N also halves per-core weight HBM traffic).
    if b_pad // tm == 1 and out_pad // tn == 1 and tn > 128:
        tn = _lane_tile_divisor(out_pad, tn // 2)

    m_tiles = b_pad // tm
    n_tiles = out_pad // tn
    k_tiles = in_pad // tk
    grid = (m_tiles, n_tiles, k_tiles)

    x_c = x.astype(compute_dtype)
    if (b_pad, in_pad) != (B, in_f):
        x_c = jnp.pad(x_c, ((0, b_pad - B), (0, in_pad - in_f)))

    # Advisory cost: weight re-streamed once per M tile, x once per N tile.
    cost = pl.CostEstimate(
        flops=2 * b_pad * in_pad * out_pad,
        transcendentals=0,
        bytes_accessed=(n_tiles * b_pad * in_pad * itemsize
                        + m_tiles * in_pad * out_pad * itemsize
                        + out_pad * 4
                        + b_pad * out_pad * out_itemsize),
    )

    vmem_limit = int(min(max(2 * footprint(tm, tn, tk), 4 << 20), vmem_budget))

    if out_is_f32:
        kernel = _kernel_accum_into_out
        scratch_shapes = []
    else:
        kernel = _kernel_scratch_acc
        scratch_shapes = [pltpu.VMEM((tm, tn), jnp.float32)]

    out = pl.pallas_call(
        kernel,
        out_shape=jax.ShapeDtypeStruct((b_pad, out_pad), out_dtype),
        grid_spec=pltpu.PrefetchScalarGridSpec(
            num_scalar_prefetch=0,
            grid=grid,
            in_specs=[
                pl.BlockSpec((tm, tk), lambda i, j, k: (i, k)),       # x tile
                pl.BlockSpec((tk, tn), lambda i, j, k: (k, j)),       # (in,out) weight tile
                pl.BlockSpec((1, out_pad), lambda i, j, k: (0, 0)),   # bias, resident
            ],
            out_specs=pl.BlockSpec((tm, tn), lambda i, j, k: (i, j)),
            scratch_shapes=scratch_shapes,
        ),
        compiler_params=pltpu.CompilerParams(
            dimension_semantics=("parallel", "parallel", "arbitrary"),
            vmem_limit_bytes=vmem_limit,
        ),
        cost_estimate=cost,
    )(x_c, wm_t, bias2d)

    return out[:B, :out_f]


def sparse_linear(x, weight, mask, bias, *, compute_dtype=jnp.bfloat16, **kw):
    """Convenience one-shot (prep + apply). Prefer prepare_* + apply in real use."""
    params = prepare_sparse_linear(weight, mask, bias, compute_dtype=compute_dtype)
    return sparse_linear_apply(params, x, **kw)


if __name__ == "__main__":
    # Small shapes consistent with the module: batch=8, in=32, out=16.
    B, IN_F, OUT_F = 8, 32, 16

    key = jax.random.PRNGKey(0)
    k_x, k_w, k_b, k_m = jax.random.split(key, 4)

    # Deterministic init mirroring reset_parameters(): U(-stdv, stdv), stdv = 1/sqrt(in).
    stdv = 1.0 / (IN_F ** 0.5)
    weight = jax.random.uniform(k_w, (OUT_F, IN_F), jnp.float32, -stdv, stdv)
    bias = jax.random.uniform(k_b, (OUT_F,), jnp.float32, -stdv, stdv)

    # Binary sparsity mask, stored (out, in) as in the module after the .t().
    mask = (jax.random.uniform(k_m, (OUT_F, IN_F)) > 0.5).astype(jnp.float32)

    # Module also pre-masks the stored weight in __init__ (idempotent for a 0/1 mask).
    weight = weight * mask

    x = jax.random.normal(k_x, (B, IN_F), jnp.float32)

    # One-time weight prep (cached, analogous to the nn.Module constructor), jitted apply.
    params = prepare_sparse_linear(weight, mask, bias)          # bf16 compute by default
    fwd = jax.jit(functools.partial(sparse_linear_apply, params))
    y = jax.block_until_ready(fwd(x))

    # Reference with the same bf16 input/weight rounding and f32 accumulation.
    x_bf = x.astype(jnp.bfloat16).astype(jnp.float32)
    w_bf = (weight * mask).astype(jnp.bfloat16).astype(jnp.float32)
    y_ref = x_bf @ w_bf.T + bias[None, :]

    assert y.shape == (B, OUT_F)
    assert jnp.allclose(y, y_ref, atol=1e-3, rtol=1e-3), float(jnp.max(jnp.abs(y - y_ref)))

    # Also sanity-check an f32 compute path against the exact f32 reference.
    y32 = jax.block_until_ready(sparse_linear(x, weight, mask, bias,
                                              compute_dtype=jnp.float32))
    y32_ref = x @ (weight * mask).T + bias[None, :]
    assert jnp.allclose(y32, y32_ref, atol=1e-5, rtol=1e-5)

    print("KERNEL_OK")
</pallas_src>

<mosaic_0001>
module attributes {stable_mosaic.version = 11 : i64} {
  func.func @_kernel_accum_into_out(%arg0: i32, %arg1: i32, %arg2: i32, %arg3: memref<16x128xbf16, #tpu.memory_space<vmem>>, %arg4: memref<128x128xbf16, #tpu.memory_space<vmem>>, %arg5: memref<1x128xf32, #tpu.memory_space<vmem>>, %arg6: memref<16x128xf32, #tpu.memory_space<vmem>>) attributes {dimension_semantics = [#tpu.dimension_semantics<parallel>, #tpu.dimension_semantics<parallel>, #tpu.dimension_semantics<arbitrary>], iteration_bounds = array<i64: 1, 1, 1>, scalar_prefetch = 0 : i64, scratch_operands = 0 : i64, tpu.core_type = #tpu.core_type<tc>, window_params = [{transform_indices = @transform_0, window_bounds = array<i64: 16, 128>}, {transform_indices = @transform_1, window_bounds = array<i64: 128, 128>}, {pipeline_mode = #tpu.pipeline_mode<synchronous>, transform_indices = @transform_2, window_bounds = array<i64: 1, 128>}, {transform_indices = @transform_3, window_bounds = array<i64: 16, 128>}]} {
    %c0_i32 = arith.constant 0 : i32
    %0 = arith.cmpi eq, %arg2, %c0_i32 : i32
    %1 = arith.extui %0 : i1 to i32
    %c0_i32_0 = arith.constant 0 : i32
    %2 = arith.cmpi ne, %1, %c0_i32_0 : i32
    scf.if %2 {
      %c128_i32 = arith.constant 128 : i32
      %9 = arith.muli %arg1, %c128_i32 : i32
      %10 = tpu.assume_multiple %9, 128 : i32
      %c0_8 = arith.constant 0 : index
      %11 = arith.index_cast %10 : i32 to index
      %12 = vector.load %arg5[%c0_8, %11] : memref<1x128xf32, #tpu.memory_space<vmem>>, vector<1x128xf32>
      %13 = vector.shape_cast %12 : vector<1x128xf32> to vector<1x128xf32>
      %14 = vector.broadcast %13 : vector<1x128xf32> to vector<16x128xf32>
      %c0_9 = arith.constant 0 : index
      %c0_10 = arith.constant 0 : index
      %15 = vector.load %arg6[%c0_9, %c0_10] : memref<16x128xf32, #tpu.memory_space<vmem>>, vector<16x128xf32>
      tpu.vector_store %arg6[%c0_9, %c0_10], %14 {strides = array<i32>} : memref<16x128xf32, #tpu.memory_space<vmem>>, vector<16x128xf32>,
    } else {
    }
    %c0 = arith.constant 0 : index
    %c0_1 = arith.constant 0 : index
    %3 = vector.load %arg6[%c0, %c0_1] : memref<16x128xf32, #tpu.memory_space<vmem>>, vector<16x128xf32>
    %c0_2 = arith.constant 0 : index
    %c0_3 = arith.constant 0 : index
    %4 = vector.load %arg3[%c0_2, %c0_3] : memref<16x128xbf16, #tpu.memory_space<vmem>>, vector<16x128xbf16>
    %c0_4 = arith.constant 0 : index
    %c0_5 = arith.constant 0 : index
    %5 = vector.load %arg4[%c0_4, %c0_5] : memref<128x128xbf16, #tpu.memory_space<vmem>>, vector<128x128xbf16>
    %cst = arith.constant dense<0.000000e+00> : vector<16x128xf32>
    %6 = tpu.matmul %4, %5, %cst {dimension_numbers = #tpu.dot_dimension_numbers<[1], [0], [0], [1], [0, 0, 1, 1], [], []>} : vector<16x128xbf16>, vector<128x128xbf16>, vector<16x128xf32> -> vector<16x128xf32>
    %7 = arith.addf %3, %6 : vector<16x128xf32>
    %c0_6 = arith.constant 0 : index
    %c0_7 = arith.constant 0 : index
    %8 = vector.load %arg6[%c0_6, %c0_7] : memref<16x128xf32, #tpu.memory_space<vmem>>, vector<16x128xf32>
    tpu.vector_store %arg6[%c0_6, %c0_7], %7 {strides = array<i32>} : memref<16x128xf32, #tpu.memory_space<vmem>>, vector<16x128xf32>,
    return
  }
  func.func @transform_0(%arg0: i32, %arg1: i32, %arg2: i32) -> (i32, i32) {
    %c0_i32 = arith.constant 0 : i32
    return %arg0, %arg2 : i32, i32
  }
  func.func @transform_1(%arg0: i32, %arg1: i32, %arg2: i32) -> (i32, i32) {
    %c0_i32 = arith.constant 0 : i32
    return %arg2, %arg1 : i32, i32
  }
  func.func @transform_2(%arg0: i32, %arg1: i32, %arg2: i32) -> (i32, i32) {
    %c0_i32 = arith.constant 0 : i32
    %c0_i32_0 = arith.constant 0 : i32
    %c0_i32_1 = arith.constant 0 : i32
    return %c0_i32, %c0_i32_0 : i32, i32
  }
  func.func @transform_3(%arg0: i32, %arg1: i32, %arg2: i32) -> (i32, i32) {
    %c0_i32 = arith.constant 0 : i32
    return %arg0, %arg1 : i32, i32
  }
}

</mosaic_0001>

<bundles_post_ra>
// kernel: sparse_linear_apply.1
= control target key start
LH: loop header
LB: loop body
LE: loop exit
PB: predicated region body
PF: predicated region fallthrough
CT: control target
= control target key end

     0   :  { %8 = vsyncpa [#allocation3], 0  ;;  %s246_s12 = smov [#allocation2]   ;;  %s286_s0 = inlined_call_operand.vmem [shape: bf16[16,128], index: 0, kind: input, shape index: {}]   ;;  %s287_s1 = inlined_call_operand.hbm [shape: bf16[128,128], index: 1, kind: input, shape index: {}]   ;;  %s288_s2 = inlined_call_operand.vmem [shape: f32[1,128], index: 2, kind: input, shape index: {}]   ;;  %s289_s3 = inlined_call_operand.vmem [shape: f32[16,128], index: 3, kind: output, shape index: {}]  }
   0x1   :  { %s16_s13 = sshll.u32 %s246_s12, 4  ;;  %s17_s13 = int_to_ptr.vmem [resolvable:$true] %s16_s13 }
   0x2   :  { %s232_s14 = scalar_lea.vmem %s17_s13, 1024  ;;  %p237_p1 = scmp.lt.s32.totalorder %s17_s13, %s17_s13 }
   0x3   :  { %p233_p0 = scmp.ne.s32.totalorder %s17_s13, %s232_s14  ;;  %p238_p2 = scmp.lt.s32.totalorder %s232_s14, %s232_s14 }
   0x5   :  { %p239_p3 = por %p238_p2, %p237_p1 }
   0x7   :  { %p240_p4 = pnand %p239_p3, %p233_p0 }
   0x9   :  { %243 = shalt.err (!%p240_p4)
}
   0xa   :  { %s247_s15 = smov 64   ;;  %s248_s16 = smov 4  }
   0xb   :  { %22 = dma.hbm_to_vmem [thread:$0]  %s287_s1, 1024, %s17_s13, [#allocation3], %s247_s15, %s247_s15, %s248_s16  }
   0xc   :  { %244 = dma.done.wait [#allocation3], 1024  }
   0xd   :  { %245 = vsyncadd [#allocation3], 4294966272  ;;  %v249_v0 = vmov 0.0   ;;  %vm250_vm0 = vmmov 0   ;;  %v215_v1 = vld [vmem:[#allocation2 + $0x38] sm:$0xff]   ;;  %v216_v2 = vld [vmem:[#allocation2 + $0x30] sm:$0xff]  }
   0xe   :  { %190 = vmatprep.subr.bf16.mxu0 %v249_v0  ;;  %206 = vmatprep.mubr.msk.bf16.mxu0 %vm250_vm0, %v249_v0  ;;  %v217_v3 = vld [vmem:[#allocation2 + $0x28] sm:$0xff]   ;;  %v218_v4 = vld [vmem:[#allocation2 + $0x20] sm:$0xff]   ;;  %v219_v5 = vld [vmem:[#allocation2 + $0x18] sm:$0xff]  }
   0xf   :  { %191 = vmatpush3.bf16.msra.mxu0 %v215_v1  ;;  %v220_v6 = vld [vmem:[#allocation2 + $0x10] sm:$0xff]   ;;  %v221_v7 = vld [vmem:[#allocation2 + $0x8] sm:$0xff]   ;;  %v222_v8 = vld [vmem:[#allocation2] sm:$0xff]  }
  0x10   :  { %192 = vmatprep.subr.bf16.mxu0 %v249_v0  ;;  %v223_v9 = vld [vmem:[%s286_s0] sm:$0xff]  }
  0x11   :  { %v171_v10 = vld [vmem:[%s288_s2] ss:$0 sm:$0xff] }
  0x13   :  { %193 = vmatpush3.bf16.msra.mxu0 %v216_v2 }
  0x14   :  { %194 = vmatprep.subr.bf16.mxu0 %v249_v0 }
  0x17   :  { %195 = vmatpush3.bf16.msra.mxu0 %v217_v3 }
  0x18   :  { %196 = vmatprep.subr.bf16.mxu0 %v249_v0 }
  0x1b   :  { %197 = vmatpush3.bf16.msra.mxu0 %v218_v4 }
  0x1c   :  { %198 = vmatprep.subr.bf16.mxu0 %v249_v0 }
  0x1f   :  { %199 = vmatpush3.bf16.msra.mxu0 %v219_v5 }
  0x20   :  { %200 = vmatprep.subr.bf16.mxu0 %v249_v0 }
  0x23   :  { %201 = vmatpush3.bf16.msra.mxu0 %v220_v6 }
  0x24   :  { %202 = vmatprep.subr.bf16.mxu0 %v249_v0 }
  0x27   :  { %203 = vmatpush3.bf16.msra.mxu0 %v221_v7 }
  0x28   :  { %204 = vmatprep.subr.bf16.mxu0 %v249_v0 }
  0x2b   :  { %205 = vmatpush3.bf16.msra.mxu0 %v222_v8 }
  0x2e   :  { %207 = vmatmul.mubr.bf16.vlgmr.msra.gmra.mxu0 %v223_v9 }
  0xee   :  { %v154_v11 = vpop.f32.mrf.mxu0 }
  0xef   :  { %v161_v12 = vadd.f32 %v171_v10, %v154_v11 }
  0xf0   :  { %v208_v13 = vpop.f32.mrf.mxu0 }
  0xf1   :  { %163 = vst [vmem:[%s289_s3] sm:$0xff] %v161_v12 }
  0xf2   :  { %v157_v14 = vpop.f32.mrf.mxu0 }
  0xf3   :  { %v162_v15 = vadd.f32 %v171_v10, %v157_v14 }
  0xf4   :  { %v209_v16 = vpop.f32.mrf.mxu0 }
  0xf5   :  { %164 = vst [vmem:[%s289_s3 + $0x8] sm:$0xff] %v162_v15 }
  0xf6   :  { %169 = vsyncpa [#allocation3], 1 }

</bundles_post_ra>
